<compile_context>
chip_gen: v6e
topology: v6e:2x2x1
jax: 0.10.0
libtpu: 0.0.40
codegen_flags: <defaults>
</compile_context>

<pallas_src>
import jax
import jax.numpy as jnp
from jax.experimental import pallas as pl
from jax.experimental.pallas import tpu as pltpu


_LANE = 128                        # TPU lane width
_TARGET_BLOCK_BYTES = 4 << 20      # ~4 MiB/block -> ~16 MiB double-buffered in+out
_VMEM_LIMIT_BYTES = 32 << 20       # safe on v5e/v6e (128 MiB phys) and v7x (64 MiB phys)
_SPLIT_THRESHOLD_BYTES = 1 << 20   # force >=2 grid blocks above this (v7x has 2 TCs)
_SMALL_FULL_BLOCK_BYTES = 2 << 20  # awkward (n % 128 != 0) sizes up to this: one block


def _hsigmoid_kernel(x_ref, o_ref):
    x = x_ref[...]
    # relu6(x + 3) / 6  == clamp(x + 3, 0, 6) / 6
    o_ref[...] = (jnp.clip(x + 3.0, 0.0, 6.0) / 6.0).astype(o_ref.dtype)


def _elementwise_call(x2d, grid, block_shape, n_elems):
    rows, lane = x2d.shape
    itemsize = jnp.dtype(x2d.dtype).itemsize
    cost = pl.CostEstimate(
        flops=4 * n_elems,
        transcendentals=0,
        bytes_accessed=2 * n_elems * itemsize,   # one read + one write
    )
    return pl.pallas_call(
        _hsigmoid_kernel,
        out_shape=jax.ShapeDtypeStruct((rows, lane), x2d.dtype),
        grid_spec=pltpu.PrefetchScalarGridSpec(
            num_scalar_prefetch=0,
            grid=grid,
            in_specs=[pl.BlockSpec(block_shape, lambda i: (i, 0))],
            out_specs=pl.BlockSpec(block_shape, lambda i: (i, 0)),
        ),
        compiler_params=pltpu.CompilerParams(
            dimension_semantics=("parallel",),
            vmem_limit_bytes=_VMEM_LIMIT_BYTES,
        ),
        cost_estimate=cost,
    )(x2d)


def _run_main(x_flat, n):
    """Pallas path for a flat array whose size n is a multiple of 128."""
    dtype = x_flat.dtype
    itemsize = jnp.dtype(dtype).itemsize

    # Widen the lane dim when divisibility allows (free view; wider DMA rows).
    lane = _LANE
    for w in (1024, 512, 256):
        if n % w == 0:
            lane = w
            break
    rows = n // lane
    x2d = x_flat.reshape(rows, lane)

    sub = max(8, 32 // itemsize)            # sublane packing: 8 f32, 16 bf16, 32 int8
    slab_bytes = n * itemsize
    budget_rows = max(sub, (_TARGET_BLOCK_BYTES // (lane * itemsize)) // sub * sub)

    if slab_bytes <= _SPLIT_THRESHOLD_BYTES or rows <= 2 * sub:
        if budget_rows >= rows:
            # Single full-extent block: always layout-legal, no ragged handling.
            return _elementwise_call(x2d, (1,), (rows, lane), n)
        br = budget_rows
    else:
        # Guarantee >= 2 blocks so both v7x TensorCores get work.
        half_rows = -(-rows // 2)                  # ceil(rows / 2)
        half_rows = -(-half_rows // sub) * sub     # round up to sublane multiple
        br = min(budget_rows, half_rows)

    grid = (pl.cdiv(rows, br),)                    # ragged trailing block is fine
    return _elementwise_call(x2d, grid, (br, lane), n)


def hsigmoid(x):
    """Elementwise hard-sigmoid: relu6(x + 3) / 6. Any shape, any float dtype."""
    orig_shape = x.shape
    n = x.size
    if n == 0:
        return x

    x_flat = jnp.ravel(x)  # free view for contiguous inputs
    itemsize = jnp.dtype(x.dtype).itemsize

    if n % _LANE == 0:
        return _run_main(x_flat, n).reshape(orig_shape)

    # Awkward sizes (n not a multiple of 128): never pad + post-slice.
    if n * itemsize <= _SMALL_FULL_BLOCK_BYTES:
        # Whole tensor in one full-extent (1, n) block -> zero extra HBM passes.
        out2d = _elementwise_call(x_flat.reshape(1, n), (1,), (1, n), n)
        return out2d.reshape(orig_shape)

    # Large awkward tensor (rare): Pallas on the multiple-of-128 prefix, plain
    # jnp on the <128-element tail, then stitch. One extra pass for the concat,
    # still cheaper than the old pad + slice (two extra passes).
    n_main = (n // _LANE) * _LANE
    out_main = _run_main(x_flat[:n_main], n_main).reshape(-1)
    tail = x_flat[n_main:]
    out_tail = (jnp.clip(tail + 3.0, 0.0, 6.0) / 6.0).astype(x.dtype)
    return jnp.concatenate([out_main, out_tail]).reshape(orig_shape)


def _ref(x):
    return jnp.clip(x + 3.0, 0.0, 6.0) / 6.0


if __name__ == "__main__":
    key = jax.random.PRNGKey(0)
    k1, k2, k3, k4 = jax.random.split(key, 4)

    # Primary check: small NCHW activation (single full-extent block, lane=1024).
    x = jax.random.normal(k1, (2, 4, 16, 16), dtype=jnp.float32) * 4.0
    out = jax.block_until_ready(hsigmoid(x))
    assert out.shape == x.shape and out.dtype == x.dtype
    assert jnp.max(jnp.abs(out - _ref(x))) < 1e-6

    # Grid > 1 with a ragged trailing block and the >=2-block split heuristic.
    x_big = jax.random.normal(k2, (4, 64, 36, 36), dtype=jnp.float32) * 4.0
    out_big = jax.block_until_ready(hsigmoid(x_big))
    assert jnp.max(jnp.abs(out_big - _ref(x_big))) < 1e-6

    # Awkward size (not a multiple of 128) -> single (1, n) full-extent block.
    x_odd = jax.random.normal(k3, (3, 5, 17, 13), dtype=jnp.float32) * 4.0
    out_odd = jax.block_until_ready(hsigmoid(x_odd))
    assert out_odd.shape == x_odd.shape
    assert jnp.max(jnp.abs(out_odd - _ref(x_odd))) < 1e-6

    # bf16 input: dtype preserved, 16-row sublane packing path.
    x_bf = (jax.random.normal(k4, (2, 32, 24, 24), dtype=jnp.float32) * 4.0
            ).astype(jnp.bfloat16)
    out_bf = jax.block_until_ready(hsigmoid(x_bf))
    assert out_bf.dtype == jnp.bfloat16 and out_bf.shape == x_bf.shape
    assert jnp.max(jnp.abs(out_bf.astype(jnp.float32)
                           - _ref(x_bf).astype(jnp.float32))) < 1e-2

    print("KERNEL_OK")
</pallas_src>

<mosaic_0001>
module attributes {stable_mosaic.version = 11 : i64} {
  func.func @_hsigmoid_kernel(%arg0: i32, %arg1: memref<2x1024xf32, #tpu.memory_space<vmem>>, %arg2: memref<2x1024xf32, #tpu.memory_space<vmem>>) attributes {dimension_semantics = [#tpu.dimension_semantics<parallel>], iteration_bounds = array<i64: 1>, scalar_prefetch = 0 : i64, scratch_operands = 0 : i64, tpu.core_type = #tpu.core_type<tc>, window_params = [{transform_indices = @transform_0, window_bounds = array<i64: 2, 1024>}, {transform_indices = @transform_1, window_bounds = array<i64: 2, 1024>}]} {
    %c0 = arith.constant 0 : index
    %c0_0 = arith.constant 0 : index
    %0 = vector.load %arg1[%c0, %c0_0] : memref<2x1024xf32, #tpu.memory_space<vmem>>, vector<2x1024xf32>
    %cst = arith.constant 3.000000e+00 : f32
    %1 = vector.broadcast %cst : f32 to vector<2x1024xf32>
    %2 = arith.addf %0, %1 : vector<2x1024xf32>
    %cst_1 = arith.constant 0.000000e+00 : f32
    %cst_2 = arith.constant 6.000000e+00 : f32
    %3 = vector.broadcast %cst_1 : f32 to vector<2x1024xf32>
    %4 = arith.maximumf %3, %2 : vector<2x1024xf32>
    %5 = vector.broadcast %cst_2 : f32 to vector<2x1024xf32>
    %6 = arith.minimumf %5, %4 : vector<2x1024xf32>
    %cst_3 = arith.constant 6.000000e+00 : f32
    %7 = vector.broadcast %cst_3 : f32 to vector<2x1024xf32>
    %8 = arith.divf %6, %7 : vector<2x1024xf32>
    %c0_4 = arith.constant 0 : index
    %c0_5 = arith.constant 0 : index
    %9 = vector.load %arg2[%c0_4, %c0_5] : memref<2x1024xf32, #tpu.memory_space<vmem>>, vector<2x1024xf32>
    tpu.vector_store %arg2[%c0_4, %c0_5], %8 {strides = array<i32>} : memref<2x1024xf32, #tpu.memory_space<vmem>>, vector<2x1024xf32>,
    return
  }
  func.func @transform_0(%arg0: i32) -> (i32, i32) {
    %c0_i32 = arith.constant 0 : i32
    %c0_i32_0 = arith.constant 0 : i32
    return %arg0, %c0_i32 : i32, i32
  }
  func.func @transform_1(%arg0: i32) -> (i32, i32) {
    %c0_i32 = arith.constant 0 : i32
    %c0_i32_0 = arith.constant 0 : i32
    return %arg0, %c0_i32 : i32, i32
  }
}

</mosaic_0001>

<bundles_post_ra>
// kernel: tpu_custom_call.1
= control target key start
LH: loop header
LB: loop body
LE: loop exit
PB: predicated region body
PF: predicated region fallthrough
CT: control target
= control target key end

     0   :  { %6 = vsyncpa [#allocation3], 0  ;;  %s113_s0 = inlined_call_operand.hbm [shape: f32[2,1024], index: 0, kind: input, shape index: {}]   ;;  %s114_s1 = inlined_call_operand.hbm [shape: f32[2,1024], index: 1, kind: output, shape index: {}]  }
   0x1   :  { %7 = vsyncpa [#allocation4], 0  ;;  %s95_s6 = smov [#allocation2]  }
   0x2   :  { %s14_s7 = sshll.u32 %s95_s6, 4  ;;  %s15_s7 = int_to_ptr.vmem [resolvable:$true] %s14_s7 }
   0x3   :  { %s59_s8 = scalar_lea.vmem %s15_s7, 256  ;;  %p64_p1 = scmp.lt.s32.totalorder %s15_s7, %s15_s7 }
   0x4   :  { %p60_p0 = scmp.ne.s32.totalorder %s15_s7, %s59_s8  ;;  %p65_p2 = scmp.lt.s32.totalorder %s59_s8, %s59_s8 }
   0x6   :  { %p66_p3 = por %p65_p2, %p64_p1 }
   0x8   :  { %p67_p4 = pnand %p66_p3, %p60_p0 }
   0xa   :  { %70 = shalt.err (!%p67_p4)
}
   0xb   :  { %17 = dma.hbm_to_vmem [thread:$0]  %s113_s0, 256, %s15_s7, [#allocation3]  }
   0xc   :  { %91 = dma.done.wait [#allocation3], 256  }
   0xd   :  { %92 = vsyncadd [#allocation3], 4294967040  ;;  %v21_v0 = vld [vmem:[#allocation2] sm:$0xff]  ;;  %v22_v1 = vld [vmem:[#allocation2 + $0x8] sm:$0xff]  ;;  %s96_s11 = smov [#allocation5]  }
   0xe   :  { %v23_v2 = vadd.f32 3.0, %v21_v0  ;;  %v24_v3 = vadd.f32 3.0, %v22_v1  ;;  %s40_s12 = sshll.u32 %s96_s11, 4  ;;  %s41_s12 = int_to_ptr.vmem [resolvable:$true] %s40_s12 }
   0xf   :  { %s71_s13 = scalar_lea.vmem %s41_s12, 256  ;;  %p76_p6 = scmp.lt.s32.totalorder %s41_s12, %s41_s12 }
  0x10   :  { %v25_v4 = vmax.f32 %v23_v2, 0.0  ;;  %v26_v5 = vmax.f32 %v24_v3, 0.0  ;;  %p72_p5 = scmp.ne.s32.totalorder %s41_s12, %s71_s13  ;;  %p77_p7 = scmp.lt.s32.totalorder %s71_s13, %s71_s13 }
  0x12   :  { %v27_v6 = vmin.f32 %v25_v4, 6.0  ;;  %v28_v7 = vmin.f32 %v26_v5, 6.0  ;;  %p78_p8 = por %p77_p7, %p76_p6 }
  0x14   :  { %v30_v8 = vmul.f32 0.16666667, %v27_v6  ;;  %v31_v9 = vmul.f32 0.16666667, %v28_v7  ;;  %p79_p9 = pnand %p78_p8, %p72_p5 }
  0x16   :  { %32 = vst [vmem:[#allocation5] sm:$0xff] %v30_v8  ;;  %33 = vst [vmem:[#allocation5 + $0x8] sm:$0xff] %v31_v9 }
  0x17   :  { %82 = shalt.err (!%p79_p9)
}
  0x18   :  { %43 = dma.vmem_to_hbm [thread:$0]  %s41_s12, 256, %s114_s1, [#allocation4]  }
  0x19   :  { %93 = dma.done.wait [#allocation4], 256  }
  0x1a   :  { %94 = vsyncadd [#allocation4], 4294967040 }
  0x1b   :  { %47 = vsyncpa [#allocation3], 1 }
  0x1c   :  { %48 = vsyncpa [#allocation4], 1 }

</bundles_post_ra>
